<compile_context>
chip_gen: v5e
topology: v5e:2x2
jax: 0.10.0
libtpu: 0.0.40
codegen_flags: <defaults>
</compile_context>

<pallas_src>
import functools

import jax
import jax.numpy as jnp
from jax.experimental import pallas as pl
from jax.experimental.pallas import tpu as pltpu


def _cdiv(a, b):
    return (a + b - 1) // b


def _head_kernel(x_ref, w_ref, o_ref, acc_ref, *,
                 true_s, ts, sub, steps_per_split, inv_s, ragged):
    """Fused mean-pool (over instances) + linear classifier head.

    x_ref  : [TB, TS, D]   instance tile (dtype of the activations)
    w_ref  : [D, C]        resident weight (transposed nn.Linear layout)
    o_ref  : [1, TB, C]    partial logits for this (split, batch-tile)
    acc_ref: [TB, SUB, D]  f32 running sum over the instance axis
    """
    p = pl.program_id(0)          # instance-reduction split (core-parallel)
    s = pl.program_id(2)          # reduction step within this split

    @pl.when(s == 0)
    def _():
        acc_ref[...] = jnp.zeros_like(acc_ref)

    def accumulate(xv):
        # xv: (TB, TS, D) f32.  Keep the accumulator sublane-shaped so the
        # steady state is pure vld + vadd; the cross-sublane (XLU) collapse
        # happens once in the finalize block.
        if sub == 1:
            acc_ref[...] += jnp.sum(xv, axis=1, keepdims=True)
        else:
            part = xv[:, 0:sub, :]
            for k in range(1, ts // sub):
                part = part + xv[:, k * sub:(k + 1) * sub, :]
            acc_ref[...] += part

    x = x_ref[...].astype(jnp.float32)

    if ragged:
        # Un-clamped global instance offset of this step; the index_map clamps
        # the block index so the DMA stays in bounds, the mask here zeroes any
        # rows at/after the true instance count.
        gstart = (p * steps_per_split + s) * ts
        is_full = gstart + ts <= true_s

        @pl.when(is_full)
        def _():
            accumulate(x)

        @pl.when(jnp.logical_not(is_full))
        def _():
            idx = jax.lax.broadcasted_iota(jnp.int32, (ts, x.shape[-1]), 0)
            accumulate(jnp.where(gstart + idx < true_s, x, 0.0))
    else:
        accumulate(x)

    @pl.when(s == pl.num_programs(2) - 1)
    def _():
        pooled = jnp.sum(acc_ref[...], axis=1) * inv_s          # mean over true S
        logits = jnp.dot(pooled, w_ref[...].astype(jnp.float32),
                         preferred_element_type=jnp.float32)
        o_ref[0] = logits.astype(o_ref.dtype)


def mean_pool_linear(x, weight, bias, *, tb=8, ts=None, n_splits=None,
                     x_tile_budget_bytes=4 * 1024 * 1024):
    """logits = x.mean(axis=1) @ weight + bias as one Pallas call.

    x      : [B, S, D]  (bags, instances per bag, feature dim) f32 or bf16
    weight : [D, C]     (transposed PyTorch nn.Linear weight)
    bias   : [C]
    """
    B, S, D = x.shape
    C = weight.shape[1]
    itemsize = jnp.dtype(x.dtype).itemsize
    w_itemsize = jnp.dtype(weight.dtype).itemsize

    # Batch tile (parallel axis).
    TB = B if B <= tb else tb
    n_b_tiles = _cdiv(B, TB)

    # Instance tile: sized from a VMEM byte budget so each grid step moves
    # >= 1-2 MiB of x (amortizes the ~0.35us/step pipeline overhead) while the
    # multi-buffered footprint stays within scoped VMEM on all generations.
    if ts is None:
        ts = x_tile_budget_bytes // max(1, TB * D * itemsize)
    ts = int(min(max(ts, 8), 1024))
    ts -= ts % 8
    ts = max(ts, 8)
    TS = S if ts >= S else ts

    total_steps = _cdiv(S, TS)
    # If there is only one batch tile, split the instance reduction into two
    # "parallel" slices so both v7x TensorCores pull HBM bandwidth.  On single
    # TensorCore chips the extra slice is essentially free.
    if n_splits is None:
        n_splits = 2 if (n_b_tiles == 1 and total_steps >= 2) else 1
    NS = int(max(1, min(n_splits, total_steps)))
    steps_per_split = _cdiv(total_steps, NS)

    ragged = (NS * steps_per_split * TS) != S      # needs in-kernel tail mask
    SUB = 8 if TS % 8 == 0 else 1                  # sublane-shaped accumulator

    kernel = functools.partial(
        _head_kernel, true_s=S, ts=TS, sub=SUB,
        steps_per_split=steps_per_split, inv_s=1.0 / float(S), ragged=ragged)

    def x_index_map(p, i, s):
        step = p * steps_per_split + s
        # Clamp so padded reduction steps never issue a fully out-of-bounds
        # DMA; their contribution is zeroed by the in-kernel mask.
        return (i, jnp.minimum(step, total_steps - 1), 0)

    x_spec_kwargs = {}
    if NS * n_b_tiles * steps_per_split >= 3:
        # Compute per step is tiny vs. the DMA -> a third buffer hides jitter.
        x_spec_kwargs["pipeline_mode"] = pl.Buffered(3)
    x_spec = pl.BlockSpec((TB, TS, D), x_index_map, **x_spec_kwargs)

    cost = pl.CostEstimate(
        flops=B * S * D + 2 * NS * B * D * C,
        transcendentals=0,
        bytes_accessed=(itemsize * B * S * D + w_itemsize * D * C
                        + 4 * NS * B * C),
    )

    partials = pl.pallas_call(
        kernel,
        out_shape=jax.ShapeDtypeStruct((NS, B, C), jnp.float32),
        grid_spec=pltpu.PrefetchScalarGridSpec(
            num_scalar_prefetch=0,
            grid=(NS, n_b_tiles, steps_per_split),
            in_specs=[
                x_spec,
                pl.BlockSpec((D, C), lambda p, i, s: (0, 0)),   # resident weight
            ],
            out_specs=pl.BlockSpec((1, TB, C), lambda p, i, s: (p, i, 0)),
            scratch_shapes=[pltpu.VMEM((TB, SUB, D), jnp.float32)],
        ),
        compiler_params=pltpu.CompilerParams(
            dimension_semantics=("parallel", "parallel", "arbitrary"),
            vmem_limit_bytes=32 * 1024 * 1024,
        ),
        cost_estimate=cost,
    )(x, weight)

    # Combine the (tiny) per-split partial logits and add the bias.
    out_dtype = jnp.promote_types(x.dtype, weight.dtype)
    logits = jnp.sum(partials, axis=0) + bias.astype(jnp.float32)[None, :]
    return logits.astype(out_dtype)


def bclassifier_forward(x, c, weight, bias, encoder=None):
    """Pallas equivalent of BClassifier.forward -> (logits, attentions)."""
    # TODO(synk): `encoder` is an arbitrary injected nn.Module in the PyTorch
    # spec (Snuffy transformer encoder); treated as an external JAX callable
    # here (identity stand-in in the demo), not translated to Pallas.
    if encoder is None:
        encoder = lambda x_, c_: (x_, c_)
    x, attentions = encoder(x, c)
    logits = mean_pool_linear(x, weight, bias)
    return logits, attentions


if __name__ == "__main__":
    key = jax.random.PRNGKey(0)
    k_x, k_c, k_w, k_b, k_x2, k_x3, k_w3, k_b3 = jax.random.split(key, 8)

    # Small shapes consistent with the module: B bags, S instances, D features,
    # C classes.
    B, S, D, C = 2, 8, 32, 2
    x = jax.random.normal(k_x, (B, S, D), dtype=jnp.float32)
    c = jax.random.normal(k_c, (B, S, D), dtype=jnp.float32)

    bound = 1.0 / (D ** 0.5)
    weight = jax.random.uniform(k_w, (D, C), minval=-bound, maxval=bound,
                                dtype=jnp.float32)
    bias = jax.random.uniform(k_b, (C,), minval=-bound, maxval=bound,
                              dtype=jnp.float32)

    logits, attentions = bclassifier_forward(x, c, weight, bias)
    jax.block_until_ready((logits, attentions))
    logits_ref = x.mean(axis=1) @ weight + bias[None, :]
    assert logits.shape == (B, C)
    assert jnp.allclose(logits, logits_ref, atol=1e-5, rtol=1e-5)
    assert jnp.array_equal(attentions, c)

    # Ragged-S path with the instance reduction split across two parallel grid
    # slices (S=200 not a multiple of the 64-wide tile, single batch tile).
    B2, S2 = 4, 200
    x2 = jax.random.normal(k_x2, (B2, S2, D), dtype=jnp.float32)
    logits2 = mean_pool_linear(x2, weight, bias, ts=64)
    jax.block_until_ready(logits2)
    logits2_ref = x2.mean(axis=1) @ weight + bias[None, :]
    assert logits2.shape == (B2, C)
    assert jnp.allclose(logits2, logits2_ref, atol=1e-4, rtol=1e-4)

    # bf16 activations (halves HBM traffic); accumulation stays f32 in VMEM.
    B3, S3, D3 = 16, 256, 128
    x3 = jax.random.normal(k_x3, (B3, S3, D3),
                           dtype=jnp.float32).astype(jnp.bfloat16)
    bound3 = 1.0 / (D3 ** 0.5)
    w3 = jax.random.uniform(k_w3, (D3, C), minval=-bound3, maxval=bound3,
                            dtype=jnp.float32).astype(jnp.bfloat16)
    b3 = jax.random.uniform(k_b3, (C,), minval=-bound3, maxval=bound3,
                            dtype=jnp.float32)
    logits3 = mean_pool_linear(x3, w3, b3, ts=64)
    jax.block_until_ready(logits3)
    ref3 = (x3.astype(jnp.float32).mean(axis=1) @ w3.astype(jnp.float32)
            + b3[None, :])
    assert logits3.shape == (B3, C)
    assert jnp.allclose(logits3.astype(jnp.float32), ref3, atol=5e-3, rtol=5e-2)

    print("KERNEL_OK")
</pallas_src>

<mosaic_0001>
module attributes {stable_mosaic.version = 11 : i64} {
  func.func @_head_kernel(%arg0: i32, %arg1: i32, %arg2: i32, %arg3: memref<2x8x32xf32, #tpu.memory_space<vmem>>, %arg4: memref<32x2xf32, #tpu.memory_space<vmem>>, %arg5: memref<1x2x2xf32, #tpu.memory_space<vmem>>, %arg6: memref<2x8x32xf32, #tpu.memory_space<vmem>>) attributes {dimension_semantics = [#tpu.dimension_semantics<parallel>, #tpu.dimension_semantics<parallel>, #tpu.dimension_semantics<arbitrary>], iteration_bounds = array<i64: 1, 1, 1>, scalar_prefetch = 0 : i64, scratch_operands = 1 : i64, tpu.core_type = #tpu.core_type<tc>, window_params = [{transform_indices = @transform_0, window_bounds = array<i64: 2, 8, 32>}, {pipeline_mode = #tpu.pipeline_mode<synchronous>, transform_indices = @transform_1, window_bounds = array<i64: 32, 2>}, {transform_indices = @transform_2, window_bounds = array<i64: 1, 2, 2>}]} {
    %c0_i32 = arith.constant 0 : i32
    %0 = arith.cmpi eq, %arg2, %c0_i32 : i32
    %1 = arith.extui %0 : i1 to i32
    %c0_i32_0 = arith.constant 0 : i32
    %2 = arith.cmpi ne, %1, %c0_i32_0 : i32
    scf.if %2 {
      %cst = arith.constant 0.000000e+00 : f32
      %10 = vector.broadcast %cst : f32 to vector<2x8x32xf32>
      %c0_11 = arith.constant 0 : index
      %c0_12 = arith.constant 0 : index
      %c0_13 = arith.constant 0 : index
      %11 = vector.load %arg6[%c0_11, %c0_12, %c0_13] : memref<2x8x32xf32, #tpu.memory_space<vmem>>, vector<2x8x32xf32>
      tpu.vector_store %arg6[%c0_11, %c0_12, %c0_13], %10 {strides = array<i32>} : memref<2x8x32xf32, #tpu.memory_space<vmem>>, vector<2x8x32xf32>,
    } else {
    }
    %c0 = arith.constant 0 : index
    %c0_1 = arith.constant 0 : index
    %c0_2 = arith.constant 0 : index
    %3 = vector.load %arg3[%c0, %c0_1, %c0_2] : memref<2x8x32xf32, #tpu.memory_space<vmem>>, vector<2x8x32xf32>
    %c0_3 = arith.constant 0 : index
    %c0_4 = arith.constant 0 : index
    %c0_5 = arith.constant 0 : index
    %4 = vector.load %arg6[%c0_3, %c0_4, %c0_5] : memref<2x8x32xf32, #tpu.memory_space<vmem>>, vector<2x8x32xf32>
    %5 = arith.addf %4, %3 : vector<2x8x32xf32>
    %c0_6 = arith.constant 0 : index
    %c0_7 = arith.constant 0 : index
    %c0_8 = arith.constant 0 : index
    %6 = vector.load %arg6[%c0_6, %c0_7, %c0_8] : memref<2x8x32xf32, #tpu.memory_space<vmem>>, vector<2x8x32xf32>
    tpu.vector_store %arg6[%c0_6, %c0_7, %c0_8], %5 {strides = array<i32>} : memref<2x8x32xf32, #tpu.memory_space<vmem>>, vector<2x8x32xf32>,
    %c0_i32_9 = arith.constant 0 : i32
    %7 = arith.cmpi eq, %arg2, %c0_i32_9 : i32
    %8 = arith.extui %7 : i1 to i32
    %c0_i32_10 = arith.constant 0 : i32
    %9 = arith.cmpi ne, %8, %c0_i32_10 : i32
    scf.if %9 {
      %c0_11 = arith.constant 0 : index
      %c0_12 = arith.constant 0 : index
      %c0_13 = arith.constant 0 : index
      %10 = vector.load %arg6[%c0_11, %c0_12, %c0_13] : memref<2x8x32xf32, #tpu.memory_space<vmem>>, vector<2x8x32xf32>
      %cst = arith.constant dense<0.000000e+00> : vector<2x32xf32>
      %11 = vector.multi_reduction <add>, %10, %cst [1] : vector<2x8x32xf32> to vector<2x32xf32>
      %cst_14 = arith.constant 1.250000e-01 : f32
      %12 = vector.broadcast %cst_14 : f32 to vector<2x32xf32>
      %13 = arith.mulf %11, %12 : vector<2x32xf32>
      %c0_15 = arith.constant 0 : index
      %c0_16 = arith.constant 0 : index
      %14 = vector.load %arg4[%c0_15, %c0_16] : memref<32x2xf32, #tpu.memory_space<vmem>>, vector<32x2xf32>
      %cst_17 = arith.constant dense<0.000000e+00> : vector<2x2xf32>
      %15 = tpu.matmul %13, %14, %cst_17 {dimension_numbers = #tpu.dot_dimension_numbers<[1], [0], [0], [1], [0, 0, 1, 1], [], []>} : vector<2x32xf32>, vector<32x2xf32>, vector<2x2xf32> -> vector<2x2xf32>
      %c0_18 = arith.constant 0 : index
      %c0_19 = arith.constant 0 : index
      %c0_20 = arith.constant 0 : index
      %16 = vector.load %arg5[%c0_18, %c0_19, %c0_20] : memref<1x2x2xf32, #tpu.memory_space<vmem>>, vector<1x2x2xf32>
      %17 = vector.shape_cast %16 : vector<1x2x2xf32> to vector<2x2xf32>
      %18 = vector.shape_cast %15 : vector<2x2xf32> to vector<1x2x2xf32>
      tpu.vector_store %arg5[%c0_18, %c0_19, %c0_20], %18 {strides = array<i32>} : memref<1x2x2xf32, #tpu.memory_space<vmem>>, vector<1x2x2xf32>,
    } else {
    }
    return
  }
  func.func @transform_0(%arg0: i32, %arg1: i32, %arg2: i32) -> (i32, i32, i32) {
    %c1_i32 = arith.constant 1 : i32
    %0 = arith.muli %arg0, %c1_i32 : i32
    %1 = arith.addi %0, %arg2 : i32
    %c0_i32 = arith.constant 0 : i32
    %2 = arith.minsi %1, %c0_i32 : i32
    %c0_i32_0 = arith.constant 0 : i32
    %c0_i32_1 = arith.constant 0 : i32
    return %arg1, %2, %c0_i32_0 : i32, i32, i32
  }
  func.func @transform_1(%arg0: i32, %arg1: i32, %arg2: i32) -> (i32, i32) {
    %c0_i32 = arith.constant 0 : i32
    %c0_i32_0 = arith.constant 0 : i32
    %c0_i32_1 = arith.constant 0 : i32
    return %c0_i32, %c0_i32_0 : i32, i32
  }
  func.func @transform_2(%arg0: i32, %arg1: i32, %arg2: i32) -> (i32, i32, i32) {
    %c0_i32 = arith.constant 0 : i32
    %c0_i32_0 = arith.constant 0 : i32
    return %arg0, %arg1, %c0_i32 : i32, i32, i32
  }
}

</mosaic_0001>

<bundles_post_ra>
// kernel: tpu_custom_call.1
= control target key start
LH: loop header
LB: loop body
LE: loop exit
PB: predicated region body
PF: predicated region fallthrough
CT: control target
= control target key end

     0   :  { %vm43_vm0 = vcmask 261120   ;;  %v159_v2 = vmov 0.0   ;;  %s204_s0 = inlined_call_operand.vmem [shape: f32[2,8,32], index: 0, kind: input, shape index: {}]   ;;  %s205_s1 = inlined_call_operand.vmem [shape: f32[32,2], index: 1, kind: input, shape index: {}]   ;;  %s206_s2 = inlined_call_operand.hbm [shape: f32[1,2,2], index: 2, kind: output, shape index: {}]  }
   0x1   :  { %v79_v0 = vld [vmem:[%s205_s1 + $0x18] sm:$0xff]  ;;  %v78_v1 = vld [vmem:[%s205_s1 + $0x10] sm:$0xff]  ;;  %44 = vst.msk [vmem:[#allocation2] sm:$0xff] %vm43_vm0, %v159_v2  ;;  %v77_v3 = vld [vmem:[%s205_s1 + $0x8] sm:$0xff] }
   0x2   :  { %98 = vmatpush.msra.mxu0 %v79_v0  ;;  %45 = vst.msk [vmem:[#allocation2 + $0x8] sm:$0xff] %vm43_vm0, %v159_v2 }
   0x3   :  { %7 = vsyncpa [#allocation4], 0  ;;  %v76_v4 = vld [vmem:[%s205_s1] sm:$0xff]  ;;  %v47_v6 = vld [vmem:[%s204_s0 + $0x8] sm:$0xff]  ;;  %vm82_vm1 = vcmask 1041409   ;;  %s115_s23 = sshll.u32 %s206_s2, 4  ;;  %s116_s23 = int_to_ptr.hbm [resolvable:$true] %s115_s23 }
   0x4   :  { %99 = vmatpush.msra.mxu0 %v78_v1  ;;  %v46_v5 = vld [vmem:[%s204_s0] sm:$0xff]  ;;  %s160_s0 = smov [#allocation3]   ;;  %vm106_vm2 = vcmask 9216  }
   0x5   :  { %s113_s1 = sshll.u32 %s160_s0, 4  ;;  %s114_s1 = int_to_ptr.vmem [resolvable:$true] %s113_s1 }
   0x6   :  { %100 = vmatpush.msra.mxu0 %v77_v3 }
   0x8   :  { %101 = vmatpush.msra.mxu0 %v76_v4  ;;  %v48_v7 = vld [vmem:[#allocation2] sm:$0xff] }
   0x9   :  { %v49_v8 = vld [vmem:[#allocation2 + $0x8] sm:$0xff]  ;;  %v50_v9 = vadd.f32 %v48_v7, %v46_v5 }
   0xa   :  { %v51_v10 = vadd.f32 %v49_v8, %v47_v6 }
   0xb   :  { %53 = vst.msk [vmem:[#allocation2] sm:$0xff] %vm43_vm0, %v50_v9 }
   0xc   :  { %54 = vst.msk [vmem:[#allocation2 + $0x8] sm:$0xff] %vm43_vm0, %v51_v10 }
  0x12   :  { %v58_v11 = vld [vmem:[#allocation2] sm:$0xff] }
  0x13   :  { %v59_v12 = vld [vmem:[#allocation2 + $0x8] sm:$0xff]  ;;  %v60_v13 = vsel %vm43_vm0, %v58_v11, 0.0 }
  0x14   :  { %v61_v14 = vrot.slane %v60_v13, 4  ;;  %v67_v15 = vsel %vm43_vm0, %v59_v12, 0.0 }
  0x15   :  { %v68_v16 = vrot.slane %v67_v15, 4 }
  0x16   :  { %v62_v17 = vadd.f32 %v61_v14, %v60_v13 }
  0x17   :  { %v69_v18 = vadd.f32 %v68_v16, %v67_v15 }
  0x18   :  { %v63_v19 = vrot.slane %v62_v17, 2 }
  0x19   :  { %v70_v20 = vrot.slane %v69_v18, 2 }
  0x1a   :  { %v64_v21 = vadd.f32 %v63_v19, %v62_v17 }
  0x1b   :  { %v71_v22 = vadd.f32 %v70_v20, %v69_v18 }
  0x1c   :  { %v65_v23 = vrot.slane %v64_v21, 1 }
  0x1d   :  { %v72_v24 = vrot.slane %v71_v22, 1 }
  0x1e   :  { %v66_v25 = vadd.f32 %v65_v23, %v64_v21 }
  0x1f   :  { %v73_v26 = vadd.f32 %v72_v24, %v71_v22 }
  0x20   :  { %v74_v27 = vmul.f32 0.125, %v66_v25 }
  0x21   :  { %v75_v28 = vmul.f32 0.125, %v73_v26 }
  0x23   :  { %v83_v29 = vsel %vm82_vm1, %v75_v28, %v74_v27 }
  0x24   :  { %130 = vmatmul.msk.f32.vlgmr.msra.gmra.mxu0 %vm43_vm0, %v83_v29 }
  0xa1   :  { %v103_v30 = vpop.f32.mrf.mxu0 }
  0xa2   :  { %107 = vst.msk [vmem:[#allocation3] sm:$0x3] %vm106_vm2, %v103_v30 }
  0xa3   :  { %118 = dma.vmem_to_hbm [thread:$0]  %s114_s1, 32, %s116_s23, [#allocation4]  }
  0xa4   :  { %157 = dma.done.wait [#allocation4], 32  }
  0xa5   :  { %158 = vsyncadd [#allocation4], 4294967264 }
  0xa6   :  { %123 = vsyncpa [#allocation4], 1 }

</bundles_post_ra>
